<compile_context>
chip_gen: v7x
topology: tpu7x:2x2x1
jax: 0.10.0
libtpu: 0.0.40
codegen_flags: <defaults>
</compile_context>

<pallas_src>
import jax
import jax.numpy as jnp
from jax.experimental import pallas as pl
from jax.experimental.pallas import tpu as pltpu

VAE_IN = 392
VAE_HID = VAE_IN // 4        # 98
VAE_EMBED = 64

HID_PAD = 128                # hidden 98  -> 128 lanes (zero-padded weights)
HEAD_PAD = 2 * VAE_EMBED     # fused [mu | logvar] head, exactly 128 lanes
OUT_PAD = 512                # recon 392 -> 512 lanes for unmasked stores


def _round_up(n, m):
    return (n + m - 1) // m * m


def _vae_kernel(x_ref, eps_ref,
                we_ref, be_ref,
                wh_ref, bh_ref,
                wd1_ref, bd1_ref,
                wd2_ref, bd2_ref,
                recon_ref, ml_ref):
    # Cast f32 activations to bf16 in-kernel (VPU cast is free on a mem-bound
    # kernel); all matmuls accumulate in f32 on the MXU.
    x = x_ref[...].astype(jnp.bfloat16)

    # Encoder: Linear(392, 128pad) + ReLU.
    h = jnp.dot(x, we_ref[...], preferred_element_type=jnp.float32) + be_ref[...]
    h = jnp.maximum(h, 0.0)

    # Fused heads: single lane-dense (TB, 128) f32 output = [mu | logvar].
    head = jnp.dot(h.astype(jnp.bfloat16), wh_ref[...],
                   preferred_element_type=jnp.float32) + bh_ref[...]
    ml_ref[...] = head

    mu = head[:, :VAE_EMBED]
    logvar = head[:, VAE_EMBED:]          # lane shift rides the idle XLU slot

    # Reparameterize in f32: z = mu + eps * exp(0.5*logvar).
    std = jnp.exp(0.5 * logvar)
    z = mu + eps_ref[...] * std

    # Decoder: Linear(64, 128pad) + ReLU -> Linear(128pad, 512pad) -> sigmoid.
    h2 = jnp.dot(z.astype(jnp.bfloat16), wd1_ref[...],
                 preferred_element_type=jnp.float32) + bd1_ref[...]
    h2 = jnp.maximum(h2, 0.0)
    logits = jnp.dot(h2.astype(jnp.bfloat16), wd2_ref[...],
                     preferred_element_type=jnp.float32) + bd2_ref[...]
    # bf16 writeback: halves the largest HBM stream; sigmoid range [0,1]
    # tolerates bf16 easily.
    recon_ref[...] = jax.nn.sigmoid(logits).astype(recon_ref.dtype)


def _choose_batch_tile(B, block_batch):
    """Batch tile: multiple of 8 (or full dim if B<8), >=2 grid steps when
    possible (v7x megacore), and minimal over-padding of the last block."""
    if B <= 8:
        return B                                  # full-dim block is legal
    nsteps = max(2, pl.cdiv(B, block_batch))
    return min(block_batch, _round_up(pl.cdiv(B, nsteps), 8))


def vae_forward(x, eps, kparams, *, block_batch=2048):
    """x: (B, 392) f32, eps: (B, 64) f32, kparams: padded/fused bf16 weights.

    Returns (recon bf16 (B,392), mu f32 (B,64), logvar f32 (B,64)).
    """
    B = x.shape[0]
    TB = _choose_batch_tile(B, block_batch)
    grid = (pl.cdiv(B, TB),)

    def batch_spec(cols):
        return pl.BlockSpec((TB, cols), lambda i: (i, 0))

    def resident_spec(a):
        # Constant block index -> weights stay resident in VMEM across steps.
        return pl.BlockSpec(a.shape, lambda i: (0, 0))

    args = (
        x, eps,
        kparams["w_enc"], kparams["b_enc"],
        kparams["w_heads"], kparams["b_heads"],
        kparams["w_dec1"], kparams["b_dec1"],
        kparams["w_dec2"], kparams["b_dec2"],
    )
    in_specs = [batch_spec(VAE_IN), batch_spec(VAE_EMBED)]
    in_specs += [resident_spec(a) for a in args[2:]]

    out_shapes = (
        jax.ShapeDtypeStruct((B, OUT_PAD), jnp.bfloat16),   # recon (lane-padded)
        jax.ShapeDtypeStruct((B, HEAD_PAD), jnp.float32),   # [mu | logvar]
    )
    out_specs = (batch_spec(OUT_PAD), batch_spec(HEAD_PAD))

    weight_bytes = sum(int(a.size) * a.dtype.itemsize for a in args[2:])
    flops = 2 * B * (VAE_IN * HID_PAD + HID_PAD * HEAD_PAD
                     + VAE_EMBED * HID_PAD + HID_PAD * OUT_PAD)
    bytes_accessed = (B * VAE_IN * 4 + B * VAE_EMBED * 4
                      + B * OUT_PAD * 2 + B * HEAD_PAD * 4 + weight_bytes)
    cost = pl.CostEstimate(flops=flops,
                           transcendentals=B * (VAE_EMBED + OUT_PAD),
                           bytes_accessed=bytes_accessed)

    recon_pad, mu_logvar = pl.pallas_call(
        _vae_kernel,
        grid=grid,
        in_specs=in_specs,
        out_specs=out_specs,
        out_shape=out_shapes,
        compiler_params=pltpu.CompilerParams(
            dimension_semantics=("parallel",),
            vmem_limit_bytes=48 * 1024 * 1024),
        cost_estimate=cost,
    )(*args)

    # NOTE: downstream consumers (BCE/KL losses) could consume the padded
    # bf16 slab + fused head directly to avoid these slice passes.
    recon = recon_pad[:, :VAE_IN]
    mu = mu_logvar[:, :VAE_EMBED]
    logvar = mu_logvar[:, VAE_EMBED:]
    return recon, mu, logvar


def init_params(key):
    """Raw f32 params (PyTorch-equivalent layout): W as (in, out), b as (out,)."""
    ks = jax.random.split(key, 10)

    def lin(kw, kb, fan_in, fan_out):
        bound = 1.0 / jnp.sqrt(fan_in)
        w = jax.random.uniform(kw, (fan_in, fan_out), jnp.float32, -bound, bound)
        b = jax.random.uniform(kb, (fan_out,), jnp.float32, -bound, bound)
        return w, b

    w_enc, b_enc = lin(ks[0], ks[1], VAE_IN, VAE_HID)
    w21, b21 = lin(ks[2], ks[3], VAE_HID, VAE_EMBED)
    w22, b22 = lin(ks[4], ks[5], VAE_HID, VAE_EMBED)
    w_dec1, b_dec1 = lin(ks[6], ks[7], VAE_EMBED, VAE_HID)
    w_dec2, b_dec2 = lin(ks[8], ks[9], VAE_HID, VAE_IN)
    return dict(w_enc=w_enc, b_enc=b_enc, w21=w21, b21=b21, w22=w22, b22=b22,
                w_dec1=w_dec1, b_dec1=b_dec1, w_dec2=w_dec2, b_dec2=b_dec2)


def prepare_kernel_params(raw):
    """Zero-pad hidden/output widths to lane-dense sizes, fuse mu/logvar heads,
    cast weights to bf16.  Done once; weights stay VMEM-resident in the kernel."""
    def pad_w(w, rows, cols):
        out = jnp.zeros((rows, cols), jnp.float32)
        out = out.at[:w.shape[0], :w.shape[1]].set(w)
        return out.astype(jnp.bfloat16)

    def pad_b(b, cols):
        return jnp.zeros((1, cols), jnp.float32).at[0, :b.shape[0]].set(b)

    w_heads = jnp.concatenate([raw["w21"], raw["w22"]], axis=1)   # (98, 128)
    b_heads = jnp.concatenate([raw["b21"], raw["b22"]], axis=0)   # (128,)

    return dict(
        w_enc=pad_w(raw["w_enc"], VAE_IN, HID_PAD),       # (392, 128)
        b_enc=pad_b(raw["b_enc"], HID_PAD),
        w_heads=pad_w(w_heads, HID_PAD, HEAD_PAD),        # (128, 128)
        b_heads=pad_b(b_heads, HEAD_PAD),
        w_dec1=pad_w(raw["w_dec1"], VAE_EMBED, HID_PAD),  # (64, 128)
        b_dec1=pad_b(raw["b_dec1"], HID_PAD),
        w_dec2=pad_w(raw["w_dec2"], HID_PAD, OUT_PAD),    # (128, 512)
        b_dec2=pad_b(raw["b_dec2"], OUT_PAD),
    )


def vae_reference(x, eps, raw):
    """Pure f32 JAX reference of the PyTorch forward (for tolerance check)."""
    h = jnp.maximum(x @ raw["w_enc"] + raw["b_enc"], 0.0)
    mu = h @ raw["w21"] + raw["b21"]
    logvar = h @ raw["w22"] + raw["b22"]
    z = mu + eps * jnp.exp(0.5 * logvar)
    h2 = jnp.maximum(z @ raw["w_dec1"] + raw["b_dec1"], 0.0)
    recon = jax.nn.sigmoid(h2 @ raw["w_dec2"] + raw["b_dec2"])
    return recon, mu, logvar


if __name__ == "__main__":
    key = jax.random.PRNGKey(0)
    k_params, k_x, k_eps = jax.random.split(key, 3)

    raw = init_params(k_params)
    kparams = prepare_kernel_params(raw)

    B = 2
    # forward() does x.view(-1, 392); we supply x already as (B, 392).
    x = jax.random.uniform(k_x, (B, VAE_IN), jnp.float32)
    # TODO(synk): eps (torch.randn_like) is supplied by the host for exact
    # reproducibility; could be generated in-kernel with pltpu.prng_* instead.
    eps = jax.random.normal(k_eps, (B, VAE_EMBED), jnp.float32)

    recon, mu, logvar = vae_forward(x, eps, kparams)
    jax.block_until_ready((recon, mu, logvar))

    assert recon.shape == (B, VAE_IN)
    assert mu.shape == (B, VAE_EMBED)
    assert logvar.shape == (B, VAE_EMBED)
    assert bool(jnp.all(jnp.isfinite(recon.astype(jnp.float32))))

    # Validate against f32 reference (bf16 weights/MXU + bf16 recon -> loose tol).
    r_recon, r_mu, r_logvar = vae_reference(x, eps, raw)
    assert bool(jnp.allclose(recon.astype(jnp.float32), r_recon, atol=7e-2))
    assert bool(jnp.allclose(mu, r_mu, atol=7e-2))
    assert bool(jnp.allclose(logvar, r_logvar, atol=7e-2))

    print("KERNEL_OK")
</pallas_src>

<mosaic_0001>
module attributes {stable_mosaic.version = 11 : i64} {
  func.func @_vae_kernel(%arg0: i32, %arg1: memref<2x392xf32, #tpu.memory_space<vmem>>, %arg2: memref<2x64xf32, #tpu.memory_space<vmem>>, %arg3: memref<392x128xbf16, #tpu.memory_space<vmem>>, %arg4: memref<1x128xf32, #tpu.memory_space<vmem>>, %arg5: memref<128x128xbf16, #tpu.memory_space<vmem>>, %arg6: memref<1x128xf32, #tpu.memory_space<vmem>>, %arg7: memref<64x128xbf16, #tpu.memory_space<vmem>>, %arg8: memref<1x128xf32, #tpu.memory_space<vmem>>, %arg9: memref<128x512xbf16, #tpu.memory_space<vmem>>, %arg10: memref<1x512xf32, #tpu.memory_space<vmem>>, %arg11: memref<2x512xbf16, #tpu.memory_space<vmem>>, %arg12: memref<2x128xf32, #tpu.memory_space<vmem>>) attributes {dimension_semantics = [#tpu.dimension_semantics<parallel>], iteration_bounds = array<i64: 1>, scalar_prefetch = 0 : i64, scratch_operands = 0 : i64, tpu.core_type = #tpu.core_type<tc>, window_params = [{transform_indices = @transform_0, window_bounds = array<i64: 2, 392>}, {transform_indices = @transform_1, window_bounds = array<i64: 2, 64>}, {pipeline_mode = #tpu.pipeline_mode<synchronous>, transform_indices = @transform_2, window_bounds = array<i64: 392, 128>}, {pipeline_mode = #tpu.pipeline_mode<synchronous>, transform_indices = @transform_3, window_bounds = array<i64: 1, 128>}, {pipeline_mode = #tpu.pipeline_mode<synchronous>, transform_indices = @transform_4, window_bounds = array<i64: 128, 128>}, {pipeline_mode = #tpu.pipeline_mode<synchronous>, transform_indices = @transform_5, window_bounds = array<i64: 1, 128>}, {pipeline_mode = #tpu.pipeline_mode<synchronous>, transform_indices = @transform_6, window_bounds = array<i64: 64, 128>}, {pipeline_mode = #tpu.pipeline_mode<synchronous>, transform_indices = @transform_7, window_bounds = array<i64: 1, 128>}, {pipeline_mode = #tpu.pipeline_mode<synchronous>, transform_indices = @transform_8, window_bounds = array<i64: 128, 512>}, {pipeline_mode = #tpu.pipeline_mode<synchronous>, transform_indices = @transform_9, window_bounds = array<i64: 1, 512>}, {transform_indices = @transform_10, window_bounds = array<i64: 2, 512>}, {transform_indices = @transform_11, window_bounds = array<i64: 2, 128>}]} {
    %c0 = arith.constant 0 : index
    %c0_0 = arith.constant 0 : index
    %0 = vector.load %arg1[%c0, %c0_0] : memref<2x392xf32, #tpu.memory_space<vmem>>, vector<2x392xf32>
    %1 = arith.truncf %0 : vector<2x392xf32> to vector<2x392xbf16>
    %c0_1 = arith.constant 0 : index
    %c0_2 = arith.constant 0 : index
    %2 = vector.load %arg3[%c0_1, %c0_2] : memref<392x128xbf16, #tpu.memory_space<vmem>>, vector<392x128xbf16>
    %cst = arith.constant dense<0.000000e+00> : vector<2x128xf32>
    %3 = tpu.matmul %1, %2, %cst {dimension_numbers = #tpu.dot_dimension_numbers<[1], [0], [0], [1], [0, 0, 1, 1], [], []>} : vector<2x392xbf16>, vector<392x128xbf16>, vector<2x128xf32> -> vector<2x128xf32>
    %c0_3 = arith.constant 0 : index
    %c0_4 = arith.constant 0 : index
    %4 = vector.load %arg4[%c0_3, %c0_4] : memref<1x128xf32, #tpu.memory_space<vmem>>, vector<1x128xf32>
    %5 = vector.broadcast %4 : vector<1x128xf32> to vector<2x128xf32>
    %6 = arith.addf %3, %5 : vector<2x128xf32>
    %cst_5 = arith.constant 0.000000e+00 : f32
    %7 = vector.broadcast %cst_5 : f32 to vector<2x128xf32>
    %8 = arith.maximumf %6, %7 : vector<2x128xf32>
    %9 = arith.truncf %8 : vector<2x128xf32> to vector<2x128xbf16>
    %c0_6 = arith.constant 0 : index
    %c0_7 = arith.constant 0 : index
    %10 = vector.load %arg5[%c0_6, %c0_7] : memref<128x128xbf16, #tpu.memory_space<vmem>>, vector<128x128xbf16>
    %cst_8 = arith.constant dense<0.000000e+00> : vector<2x128xf32>
    %11 = tpu.matmul %9, %10, %cst_8 {dimension_numbers = #tpu.dot_dimension_numbers<[1], [0], [0], [1], [0, 0, 1, 1], [], []>} : vector<2x128xbf16>, vector<128x128xbf16>, vector<2x128xf32> -> vector<2x128xf32>
    %c0_9 = arith.constant 0 : index
    %c0_10 = arith.constant 0 : index
    %12 = vector.load %arg6[%c0_9, %c0_10] : memref<1x128xf32, #tpu.memory_space<vmem>>, vector<1x128xf32>
    %13 = vector.broadcast %12 : vector<1x128xf32> to vector<2x128xf32>
    %14 = arith.addf %11, %13 : vector<2x128xf32>
    %c0_11 = arith.constant 0 : index
    %c0_12 = arith.constant 0 : index
    %15 = vector.load %arg12[%c0_11, %c0_12] : memref<2x128xf32, #tpu.memory_space<vmem>>, vector<2x128xf32>
    tpu.vector_store %arg12[%c0_11, %c0_12], %14 {strides = array<i32>} : memref<2x128xf32, #tpu.memory_space<vmem>>, vector<2x128xf32>,
    %16 = vector.extract_strided_slice %14 {offsets = [0, 0], sizes = [2, 64], strides = [1, 1]} : vector<2x128xf32> to vector<2x64xf32>
    %17 = vector.extract_strided_slice %14 {offsets = [0, 64], sizes = [2, 64], strides = [1, 1]} : vector<2x128xf32> to vector<2x64xf32>
    %cst_13 = arith.constant 5.000000e-01 : f32
    %18 = vector.broadcast %cst_13 : f32 to vector<2x64xf32>
    %19 = arith.mulf %18, %17 : vector<2x64xf32>
    %20 = math.exp %19 : vector<2x64xf32>
    %c0_14 = arith.constant 0 : index
    %c0_15 = arith.constant 0 : index
    %21 = vector.load %arg2[%c0_14, %c0_15] : memref<2x64xf32, #tpu.memory_space<vmem>>, vector<2x64xf32>
    %22 = arith.mulf %21, %20 : vector<2x64xf32>
    %23 = arith.addf %16, %22 : vector<2x64xf32>
    %24 = arith.truncf %23 : vector<2x64xf32> to vector<2x64xbf16>
    %c0_16 = arith.constant 0 : index
    %c0_17 = arith.constant 0 : index
    %25 = vector.load %arg7[%c0_16, %c0_17] : memref<64x128xbf16, #tpu.memory_space<vmem>>, vector<64x128xbf16>
    %cst_18 = arith.constant dense<0.000000e+00> : vector<2x128xf32>
    %26 = tpu.matmul %24, %25, %cst_18 {dimension_numbers = #tpu.dot_dimension_numbers<[1], [0], [0], [1], [0, 0, 1, 1], [], []>} : vector<2x64xbf16>, vector<64x128xbf16>, vector<2x128xf32> -> vector<2x128xf32>
    %c0_19 = arith.constant 0 : index
    %c0_20 = arith.constant 0 : index
    %27 = vector.load %arg8[%c0_19, %c0_20] : memref<1x128xf32, #tpu.memory_space<vmem>>, vector<1x128xf32>
    %28 = vector.broadcast %27 : vector<1x128xf32> to vector<2x128xf32>
    %29 = arith.addf %26, %28 : vector<2x128xf32>
    %cst_21 = arith.constant 0.000000e+00 : f32
    %30 = vector.broadcast %cst_21 : f32 to vector<2x128xf32>
    %31 = arith.maximumf %29, %30 : vector<2x128xf32>
    %32 = arith.truncf %31 : vector<2x128xf32> to vector<2x128xbf16>
    %c0_22 = arith.constant 0 : index
    %c0_23 = arith.constant 0 : index
    %33 = vector.load %arg9[%c0_22, %c0_23] : memref<128x512xbf16, #tpu.memory_space<vmem>>, vector<128x512xbf16>
    %cst_24 = arith.constant dense<0.000000e+00> : vector<2x512xf32>
    %34 = tpu.matmul %32, %33, %cst_24 {dimension_numbers = #tpu.dot_dimension_numbers<[1], [0], [0], [1], [0, 0, 1, 1], [], []>} : vector<2x128xbf16>, vector<128x512xbf16>, vector<2x512xf32> -> vector<2x512xf32>
    %c0_25 = arith.constant 0 : index
    %c0_26 = arith.constant 0 : index
    %35 = vector.load %arg10[%c0_25, %c0_26] : memref<1x512xf32, #tpu.memory_space<vmem>>, vector<1x512xf32>
    %36 = vector.broadcast %35 : vector<1x512xf32> to vector<2x512xf32>
    %37 = arith.addf %34, %36 : vector<2x512xf32>
    %38 = arith.negf %37 : vector<2x512xf32>
    %39 = math.exp %38 : vector<2x512xf32>
    %cst_27 = arith.constant 1.000000e+00 : f32
    %40 = vector.broadcast %cst_27 : f32 to vector<2x512xf32>
    %41 = arith.addf %40, %39 : vector<2x512xf32>
    %42 = arith.divf %40, %41 : vector<2x512xf32>
    %43 = arith.truncf %42 : vector<2x512xf32> to vector<2x512xbf16>
    %c0_28 = arith.constant 0 : index
    %c0_29 = arith.constant 0 : index
    %44 = vector.load %arg11[%c0_28, %c0_29] : memref<2x512xbf16, #tpu.memory_space<vmem>>, vector<2x512xbf16>
    tpu.vector_store %arg11[%c0_28, %c0_29], %43 {strides = array<i32>} : memref<2x512xbf16, #tpu.memory_space<vmem>>, vector<2x512xbf16>,
    return
  }
  func.func @transform_0(%arg0: i32) -> (i32, i32) {
    %c0_i32 = arith.constant 0 : i32
    %c0_i32_0 = arith.constant 0 : i32
    return %arg0, %c0_i32 : i32, i32
  }
  func.func @transform_1(%arg0: i32) -> (i32, i32) {
    %c0_i32 = arith.constant 0 : i32
    %c0_i32_0 = arith.constant 0 : i32
    return %arg0, %c0_i32 : i32, i32
  }
  func.func @transform_2(%arg0: i32) -> (i32, i32) {
    %c0_i32 = arith.constant 0 : i32
    %c0_i32_0 = arith.constant 0 : i32
    %c0_i32_1 = arith.constant 0 : i32
    return %c0_i32, %c0_i32_0 : i32, i32
  }
  func.func @transform_3(%arg0: i32) -> (i32, i32) {
    %c0_i32 = arith.constant 0 : i32
    %c0_i32_0 = arith.constant 0 : i32
    %c0_i32_1 = arith.constant 0 : i32
    return %c0_i32, %c0_i32_0 : i32, i32
  }
  func.func @transform_4(%arg0: i32) -> (i32, i32) {
    %c0_i32 = arith.constant 0 : i32
    %c0_i32_0 = arith.constant 0 : i32
    %c0_i32_1 = arith.constant 0 : i32
    return %c0_i32, %c0_i32_0 : i32, i32
  }
  func.func @transform_5(%arg0: i32) -> (i32, i32) {
    %c0_i32 = arith.constant 0 : i32
    %c0_i32_0 = arith.constant 0 : i32
    %c0_i32_1 = arith.constant 0 : i32
    return %c0_i32, %c0_i32_0 : i32, i32
  }
  func.func @transform_6(%arg0: i32) -> (i32, i32) {
    %c0_i32 = arith.constant 0 : i32
    %c0_i32_0 = arith.constant 0 : i32
    %c0_i32_1 = arith.constant 0 : i32
    return %c0_i32, %c0_i32_0 : i32, i32
  }
  func.func @transform_7(%arg0: i32) -> (i32, i32) {
    %c0_i32 = arith.constant 0 : i32
    %c0_i32_0 = arith.constant 0 : i32
    %c0_i32_1 = arith.constant 0 : i32
    return %c0_i32, %c0_i32_0 : i32, i32
  }
  func.func @transform_8(%arg0: i32) -> (i32, i32) {
    %c0_i32 = arith.constant 0 : i32
    %c0_i32_0 = arith.constant 0 : i32
    %c0_i32_1 = arith.constant 0 : i32
    return %c0_i32, %c0_i32_0 : i32, i32
  }
  func.func @transform_9(%arg0: i32) -> (i32, i32) {
    %c0_i32 = arith.constant 0 : i32
    %c0_i32_0 = arith.constant 0 : i32
    %c0_i32_1 = arith.constant 0 : i32
    return %c0_i32, %c0_i32_0 : i32, i32
  }
  func.func @transform_10(%arg0: i32) -> (i32, i32) {
    %c0_i32 = arith.constant 0 : i32
    %c0_i32_0 = arith.constant 0 : i32
    return %arg0, %c0_i32 : i32, i32
  }
  func.func @transform_11(%arg0: i32) -> (i32, i32) {
    %c0_i32 = arith.constant 0 : i32
    %c0_i32_0 = arith.constant 0 : i32
    return %arg0, %c0_i32 : i32, i32
  }
}

</mosaic_0001>

<bundles_post_ra>
// kernel: tpu_custom_call.1
= control target key start
LH: loop header
LB: loop body
LE: loop exit
PB: predicated region body
PF: predicated region fallthrough
CT: control target
= control target key end

     0   :  { %17 = vsyncpa [#allocation3], 0  ;;  %s1670_s0 = inlined_call_operand.hbm [shape: f32[2,392], index: 0, kind: input, shape index: {}]   ;;  %s1671_s1 = inlined_call_operand.vmem [shape: f32[2,64], index: 1, kind: input, shape index: {}]   ;;  %s1672_s2 = inlined_call_operand.hbm [shape: bf16[392,128], index: 2, kind: input, shape index: {}]   ;;  %s1673_s3 = inlined_call_operand.vmem [shape: f32[1,128], index: 3, kind: input, shape index: {}]   ;;  %s1674_s4 = inlined_call_operand.hbm [shape: bf16[128,128], index: 4, kind: input, shape index: {}]   ;;  %s1675_s5 = inlined_call_operand.vmem [shape: f32[1,128], index: 5, kind: input, shape index: {}]   ;;  %s1676_s6 = inlined_call_operand.hbm [shape: bf16[64,128], index: 6, kind: input, shape index: {}]   ;;  %s1677_s7 = inlined_call_operand.vmem [shape: f32[1,128], index: 7, kind: input, shape index: {}]   ;;  %s1678_s8 = inlined_call_operand.hbm [shape: bf16[128,512], index: 8, kind: input, shape index: {}]   ;;  %s1679_s9 = inlined_call_operand.vmem [shape: f32[1,512], index: 9, kind: input, shape index: {}]   ;;  %s1680_s10 = inlined_call_operand.hbm [shape: bf16[2,512], index: 10, kind: output, shape index: {0}]   ;;  %s1681_s11 = inlined_call_operand.hbm [shape: f32[2,128], index: 11, kind: output, shape index: {1}]  }
   0x1   :  { %18 = vsyncpa [#allocation6], 0 }
   0x2   :  { %19 = vsyncpa [#allocation9], 0 }
   0x3   :  { %20 = vsyncpa [#allocation4], 0 }
   0x4   :  { %21 = vsyncpa [#allocation13], 0  ;;  %s1452_s17 = smov [#allocation5]   ;;  %s1288_s21 = scalar_lea.hbm %s1672_s2, 3136 }
   0x5   :  { %s39_s18 = sshll.u32 %s1452_s17, 4  ;;  %p1289_p0 = scmp.ne.s32.totalorder %s1672_s2, %s1288_s21  ;;  %s40_s18 = int_to_ptr.vmem [resolvable:$true] %s39_s18 }
   0x6   :  { %p1292_p1 = scmp.lt.u32.totalorder %s1288_s21, %s1672_s2 }
   0x8   :  { %p1294_p2 = pnand %p1292_p1, %p1289_p0 }
   0xa   :  { %1297 = shalt.err (!%p1294_p2)
}
   0xb   :  { %s1298_s26 = scalar_lea.vmem %s40_s18, 3136  ;;  %p1303_p4 = scmp.lt.s32.totalorder %s40_s18, %s40_s18 }
   0xc   :  { %p1299_p3 = scmp.ne.s32.totalorder %s40_s18, %s1298_s26  ;;  %p1304_p5 = scmp.lt.s32.totalorder %s1298_s26, %s1298_s26 }
   0xe   :  { %p1305_p6 = por %p1304_p5, %p1303_p4 }
  0x10   :  { %p1306_p7 = pnand %p1305_p6, %p1299_p3 }
  0x12   :  { %1309 = shalt.err (!%p1306_p7)
}
  0x13   :  { %s1453_s27 = smov 64   ;;  %s1454_s28 = smov 4  }
  0x14   :  { %45 = dma.hbm_to_vmem [thread:$0]  %s1672_s2, 3136, %s40_s18, [#allocation6], %s1453_s27, %s1453_s27, %s1454_s28  }
  0x15   :  { %s1455_s12 = smov [#allocation8]   ;;  %s1456_s14 = smov [#allocation2]  }
  0x16   :  { %s67_s13 = sshll.u32 %s1455_s12, 4  ;;  %s28_s15 = sshll.u32 %s1456_s14, 4  ;;  %s68_s13 = int_to_ptr.vmem [resolvable:$true] %s67_s13  ;;  %s29_s15 = int_to_ptr.vmem [resolvable:$true] %s28_s15 }
  0x17   :  { %s1310_s19 = scalar_lea.hbm %s1676_s6, 512 }
  0x18   :  { %p1311_p8 = scmp.ne.s32.totalorder %s1676_s6, %s1310_s19  ;;  %p1314_p9 = scmp.lt.u32.totalorder %s1310_s19, %s1676_s6 }
  0x1a   :  { %p1316_p10 = pnand %p1314_p9, %p1311_p8 }
  0x1c   :  { %1319 = shalt.err (!%p1316_p10)
}
  0x1d   :  { %s1320_s2 = scalar_lea.vmem %s68_s13, 512  ;;  %p1325_p12 = scmp.lt.s32.totalorder %s68_s13, %s68_s13 }
  0x1e   :  { %p1321_p11 = scmp.ne.s32.totalorder %s68_s13, %s1320_s2  ;;  %p1326_p13 = scmp.lt.s32.totalorder %s1320_s2, %s1320_s2 }
  0x20   :  { %p1327_p0 = por %p1326_p13, %p1325_p12 }
  0x22   :  { %p1328_p1 = pnand %p1327_p0, %p1321_p11 }
  0x24   :  { %1331 = shalt.err (!%p1328_p1)
}
  0x25   :  { %73 = dma.hbm_to_vmem [thread:$0]  %s1676_s6, 512, %s68_s13, [#allocation9], %s1453_s27, %s1453_s27, %s1454_s28  }
  0x26   :  { %s1332_s29 = scalar_lea.hbm %s1670_s0, 128 }
  0x27   :  { %p1333_p2 = scmp.ne.s32.totalorder %s1670_s0, %s1332_s29  ;;  %p1336_p3 = scmp.lt.u32.totalorder %s1332_s29, %s1670_s0 }
  0x29   :  { %p1338_p4 = pnand %p1336_p3, %p1333_p2 }
  0x2b   :  { %1341 = shalt.err (!%p1338_p4)
}
  0x2c   :  { %s1342_s17 = scalar_lea.vmem %s29_s15, 128  ;;  %p1347_p6 = scmp.lt.s32.totalorder %s29_s15, %s29_s15 }
  0x2d   :  { %p1343_p5 = scmp.ne.s32.totalorder %s29_s15, %s1342_s17  ;;  %p1348_p7 = scmp.lt.s32.totalorder %s1342_s17, %s1342_s17 }
  0x2f   :  { %p1349_p8 = por %p1348_p7, %p1347_p6 }
  0x31   :  { %p1350_p9 = pnand %p1349_p8, %p1343_p5 }
  0x33   :  { %1353 = shalt.err (!%p1350_p9)
}
  0x34   :  { %31 = dma.hbm_to_vmem [thread:$0]  %s1670_s0, 128, %s29_s15, [#allocation3]  }
  0x35   :  { %s1457_s19 = smov [#allocation7]   ;;  %s1458_s21 = smov [#allocation10]  }
  0x36   :  { %s53_s20 = sshll.u32 %s1457_s19, 4  ;;  %s81_s22 = sshll.u32 %s1458_s21, 4  ;;  %s54_s20 = int_to_ptr.vmem [resolvable:$true] %s53_s20  ;;  %s82_s22 = int_to_ptr.vmem [resolvable:$true] %s81_s22 }
  0x37   :  { %s1354_s18 = scalar_lea.hbm %s1674_s4, 1024 }
  0x38   :  { %p1355_p10 = scmp.ne.s32.totalorder %s1674_s4, %s1354_s18  ;;  %p1358_p11 = scmp.lt.u32.totalorder %s1354_s18, %s1674_s4 }
  0x3a   :  { %p1360_p12 = pnand %p1358_p11, %p1355_p10 }
  0x3c   :  { %1363 = shalt.err (!%p1360_p12)
}
  0x3d   :  { %s1364_s0 = scalar_lea.vmem %s54_s20, 1024  ;;  %p1369_p0 = scmp.lt.s32.totalorder %s54_s20, %s54_s20 }
  0x3e   :  { %p1365_p13 = scmp.ne.s32.totalorder %s54_s20, %s1364_s0  ;;  %p1370_p1 = scmp.lt.s32.totalorder %s1364_s0, %s1364_s0 }
  0x40   :  { %p1371_p2 = por %p1370_p1, %p1369_p0 }
  0x42   :  { %p1372_p3 = pnand %p1371_p2, %p1365_p13 }
  0x44   :  { %1375 = shalt.err (!%p1372_p3)
}
  0x45   :  { %59 = dma.hbm_to_vmem [thread:$0]  %s1674_s4, 1024, %s54_s20, [#allocation6], %s1453_s27, %s1453_s27, %s1454_s28  }
  0x46   :  { %s1376_s16 = scalar_lea.hbm %s1678_s8, 4096 }
  0x47   :  { %p1377_p4 = scmp.ne.s32.totalorder %s1678_s8, %s1376_s16  ;;  %p1380_p5 = scmp.lt.u32.totalorder %s1376_s16, %s1678_s8 }
  0x49   :  { %p1382_p6 = pnand %p1380_p5, %p1377_p4 }
  0x4b   :  { %1385 = shalt.err (!%p1382_p6)
}
  0x4c   :  { %s1386_s21 = scalar_lea.vmem %s82_s22, 4096  ;;  %p1391_p8 = scmp.lt.s32.totalorder %s82_s22, %s82_s22 }
  0x4d   :  { %p1387_p7 = scmp.ne.s32.totalorder %s82_s22, %s1386_s21  ;;  %p1392_p9 = scmp.lt.s32.totalorder %s1386_s21, %s1386_s21 }
  0x4f   :  { %p1393_p10 = por %p1392_p9, %p1391_p8 }
  0x51   :  { %p1394_p11 = pnand %p1393_p10, %p1387_p7 }
  0x53   :  { %1397 = shalt.err (!%p1394_p11)
}
  0x54   :  { %s1459_s4 = smov 256   ;;  %s1460_s28 = smov 16  }
  0x55   :  { %87 = dma.hbm_to_vmem [thread:$0]  %s1678_s8, 4096, %s82_s22, [#allocation9], %s1459_s4, %s1459_s4, %s1460_s28  }
  0x56   :  { %1442 = dma.done.wait [#allocation3], 128  }
  0x57   :  { %1443 = vsyncadd [#allocation3], 4294967168 }
  0x58   :  { %1444 = dma.done.wait [#allocation6], 4160  }
  0x59   :  { %1445 = vsyncadd [#allocation6], 4294963136 }
  0x5a   :  { %1446 = dma.done.wait [#allocation9], 4608  }
  0x5b   :  { %1447 = vsyncadd [#allocation9], 4294962688  ;;  %v1461_v0 = vmov 0   ;;  %v1184_v1 = vld [vmem:[#allocation5 + $0x40] sm:$0xff]   ;;  %v1187_v4 = vld [vmem:[#allocation5 + $0x48] sm:$0xff]   ;;  %v112_v16 = vlaneseq  ;;  %vm340_vm0 = vcmask 1043456  }
  0x5c   :  { %384 = vmatprep.subr.bf16.mxu1 %v1461_v0  ;;  %v1185_v2 = vld [vmem:[#allocation5 + $0x80] sm:$0xff]   ;;  %1100 = vmatprep.subr.bf16.mxu0 %v1184_v1  ;;  %v1188_v5 = vld [vmem:[#allocation5 + $0x88] sm:$0xff]   ;;  %v1190_v7 = vld [vmem:[#allocation5 + $0x50] sm:$0xff]   ;;  %v1462_v14 = vmov 1983009808   ;;  %vm336_vm1 = vcmask 64512  }
  0x5d   :  { %v1186_v3 = vld [vmem:[#allocation5] sm:$0xff]   ;;  %385 = vmatpush1.bf16.msra.mxu1 %v1185_v2  ;;  %v1189_v6 = vld [vmem:[#allocation5 + $0x8] sm:$0xff]   ;;  %v1191_v8 = vld [vmem:[#allocation5 + $0x90] sm:$0xff]   ;;  %v110_v15 = vunpack.c.l.s4 %v1462_v14  ;;  %v1602_v21 = vshrl.u32 %v112_v16, 7  ;;  %v1463_v43 = vmov 0.0   ;;  %vm1464_vm2 = vmmov 0  }
  0x5e   :  { %1101 = vmatpush3.bf16.msra.mxu0 %v1186_v3  ;;  %386 = vmatprep.subr.bf16.mxu1 %v1461_v0  ;;  %v1192_v9 = vld [vmem:[#allocation5 + $0x10] sm:$0xff]   ;;  %v1193_v10 = vld [vmem:[#allocation5 + $0x58] sm:$0xff]   ;;  %v1196_v13 = vld [vmem:[#allocation5 + $0x60] sm:$0xff]   ;;  %vm588_vm3 = vcmask 523264   ;;  %s1465_s24 = smov [#allocation12]  }
  0x5f   :  { %1102 = vmatprep.subr.bf16.mxu0 %v1187_v4  ;;  %v1194_v11 = vld [vmem:[#allocation5 + $0x98] sm:$0xff]   ;;  %v1197_v17 = vld [vmem:[#allocation5 + $0xa0] sm:$0xff]   ;;  %v1199_v19 = vld [vmem:[#allocation5 + $0x68] sm:$0xff]   ;;  %v111_v20 = vunpack.c.0.s8 %v110_v15  ;;  %s1004_s25 = sshll.u32 %s1465_s24, 4  ;;  %s1005_s25 = int_to_ptr.vmem [resolvable:$true] %s1004_s25 }
  0x60   :  { %v1195_v12 = vld [vmem:[#allocation5 + $0x18] sm:$0xff]   ;;  %v1198_v18 = vld [vmem:[#allocation5 + $0x20] sm:$0xff]   ;;  %v1200_v22 = vld [vmem:[#allocation5 + $0xa8] sm:$0xff]   ;;  %s1398_s26 = scalar_lea.vmem %s1005_s25, 32  ;;  %p1403_p13 = scmp.lt.s32.totalorder %s1005_s25, %s1005_s25 }
  0x61   :  { %387 = vmatpush1.bf16.msra.mxu1 %v1188_v5  ;;  %v1201_v23 = vld [vmem:[#allocation5 + $0x28] sm:$0xff]   ;;  %v1202_v24 = vld [vmem:[#allocation5 + $0x70] sm:$0xff]   ;;  %v114_v25 = vsub.s32 %v111_v20, %v1602_v21  ;;  %v1205_v28 = vld [vmem:[#allocation5 + $0x78] sm:$0xff]   ;;  %p1399_p12 = scmp.ne.s32.totalorder %s1005_s25, %s1398_s26  ;;  %p1404_p0 = scmp.lt.s32.totalorder %s1398_s26, %s1398_s26 }
  0x62   :  { %1103 = vmatpush3.bf16.msra.mxu0 %v1189_v6  ;;  %388 = vmatprep.subr.bf16.mxu1 %v1461_v0  ;;  %v1203_v26 = vld [vmem:[#allocation5 + $0xb0] sm:$0xff]   ;;  %v106_v29 = vld [vmem:[#allocation2] sm:$0xff]  ;;  %v1209_v32 = vld [vmem:[#allocation5 + $0xc0] ss:$0 sps:$4 sm:$0xff]  }
  0x63   :  { %1104 = vmatprep.subr.bf16.mxu0 %v1190_v7  ;;  %v1204_v27 = vld [vmem:[#allocation5 + $0x30] sm:$0xff]   ;;  %v108_v30 = vcombine.high %v106_v29, %v106_v29  ;;  %v115_v31 = vrot.slane %v106_v29, %v114_v25  ;;  %v1206_v33 = vld [vmem:[#allocation5 + $0xb8] sm:$0xff]   ;;  %v342_v38 = vsel %vm340_vm0, %v1209_v32, 0  ;;  %v1210_v40 = vld [vmem:[#allocation7] sm:$0xff]   ;;  %p1405_p1 = por %p1404_p0, %p1403_p13 }
  0x64   :  { %v1207_v36 = vld [vmem:[#allocation5 + $0x38] sm:$0xff]   ;;  %v1211_v45 = vld [vmem:[#allocation7 + $0x8] sm:$0xff]   ;;  %v1214_v48 = vld [vmem:[#allocation7 + $0x20] sm:$0xff]  }
  0x65   :  { %389 = vmatpush1.bf16.msra.mxu1 %v1191_v8  ;;  %v123_v34 = vcombine.high %v115_v31, %v115_v31  ;;  %v122_v35 = vrot.slane %v108_v30, %v114_v25  ;;  %v129_v41 = vpack.c.bf16 %v115_v31, %v115_v31  ;;  %v1212_v46 = vld [vmem:[#allocation7 + $0x10] sm:$0xff]   ;;  %v1213_v47 = vld [vmem:[#allocation7 + $0x18] sm:$0xff]   ;;  %v1215_v49 = vld [vmem:[#allocation7 + $0x28] sm:$0xff]   ;;  %p1406_p2 = pnand %p1405_p1, %p1399_p12 }
  0x66   :  { %1105 = vmatpush3.bf16.msra.mxu0 %v1192_v9  ;;  %390 = vmatprep.subr.bf16.mxu1 %v1461_v0  ;;  %v1216_v50 = vld [vmem:[#allocation7 + $0x30] sm:$0xff]   ;;  %v1217_v51 = vld [vmem:[#allocation7 + $0x38] sm:$0xff]   ;;  %v1218_v3 = vld [vmem:[#allocation8] sm:$0xff]  }
  0x67   :  { %1106 = vmatprep.subr.bf16.mxu0 %v1193_v10  ;;  %v130_v37 = vpack.c.bf16 %v123_v34, %v123_v34  ;;  %v124_v39 = vcombine.high %v122_v35, %v122_v35  ;;  %v131_v44 = vpack.c.bf16 %v122_v35, %v122_v35  ;;  %v1019_v54 = vld [vmem:[%s1673_s3] ss:$0 sm:$0xff]  ;;  %v1219_v4 = vld [vmem:[#allocation8 + $0x8] sm:$0xff]   ;;  %v1221_v14 = vld [vmem:[#allocation8 + $0x18] sm:$0xff]  }
  0x68   :  { %v1046_v5 = vld [vmem:[%s1675_s5] ss:$0 sm:$0xff]  ;;  %v1225_v16 = vld [vmem:[#allocation10 + $0x8] ss:$16 sps:$4 sm:$0xff]   ;;  %v1263_v30 = vld [vmem:[#allocation10 + $0xcc] ss:$16 sps:$4 sm:$0xff]  }
  0x69   :  { %391 = vmatpush1.bf16.msra.mxu1 %v1194_v11  ;;  %376 = vmatprep.mubr.bf16.mxu0 %v130_v37  ;;  %v132_v42 = vpack.c.bf16 %v124_v39, %v124_v39  ;;  %v1220_v10 = vld [vmem:[#allocation8 + $0x10] sm:$0xff]   ;;  %v1243_v25 = vld [vmem:[#allocation10 + $0x68] ss:$16 sps:$4 sm:$0xff]  }
  0x6a   :  { %1107 = vmatpush3.bf16.msra.mxu0 %v1195_v12  ;;  %392 = vmatprep.subr.bf16.mxu1 %v1461_v0  ;;  %v1224_v15 = vld [vmem:[#allocation10 + $0x4] ss:$16 sps:$4 sm:$0xff]   ;;  %v1255_v29 = vld [vmem:[#allocation10 + $0xa8] ss:$16 sps:$4 sm:$0xff]   ;;  %v1228_v39 = vld [vmem:[#allocation10 + $0x20] ss:$16 sps:$4 sm:$0xff]  }
  0x6b   :  { %1108 = vmatprep.subr.bf16.mxu0 %v1196_v13  ;;  %1045 = vmatprep.mubr.msk.bf16.mxu1 %vm336_vm1, %v132_v42  ;;  %v1261_v31 = vld [vmem:[#allocation10 + $0xc8] ss:$16 sps:$4 sm:$0xff]   ;;  %v541_v32 = vld [vmem:[%s1671_s1] sm:$0x3] }
  0x6c   :  { %v1242_v42 = vld [vmem:[#allocation10 + $0x64] ss:$16 sps:$4 sm:$0xff]  }
  0x6d   :  { %393 = vmatpush1.bf16.msra.mxu1 %v1197_v17  ;;  %v1227_v17 = vld [vmem:[#allocation10 + $0xc] ss:$16 sps:$4 sm:$0xff]  }
  0x6e   :  { %1109 = vmatpush3.bf16.msra.mxu0 %v1198_v18  ;;  %394 = vmatprep.subr.bf16.mxu1 %v1461_v0  ;;  %v1233_v18 = vld [vmem:[#allocation10 + $0x2c] ss:$16 sps:$4 sm:$0xff]  }
  0x6f   :  { %1110 = vmatprep.subr.bf16.mxu0 %v1199_v19  ;;  %v1231_v19 = vld [vmem:[#allocation10 + $0x28] ss:$16 sps:$4 sm:$0xff]  }
  0x71   :  { %395 = vmatpush1.bf16.msra.mxu1 %v1200_v22  ;;  %v1239_v22 = vld [vmem:[#allocation10 + $0x4c] ss:$16 sps:$4 sm:$0xff]  }
  0x72   :  { %1111 = vmatpush3.bf16.msra.mxu0 %v1201_v23  ;;  %396 = vmatprep.subr.bf16.mxu1 %v1461_v0  ;;  %v1237_v23 = vld [vmem:[#allocation10 + $0x48] ss:$16 sps:$4 sm:$0xff]  }
  0x73   :  { %1112 = vmatprep.subr.bf16.mxu0 %v1202_v24  ;;  %v1245_v24 = vld [vmem:[#allocation10 + $0x6c] ss:$16 sps:$4 sm:$0xff]  }
  0x75   :  { %397 = vmatpush1.bf16.msra.mxu1 %v1203_v26  ;;  %v1251_v26 = vld [vmem:[#allocation10 + $0x8c] ss:$16 sps:$4 sm:$0xff]  }
  0x76   :  { %1113 = vmatpush3.bf16.msra.mxu0 %v1204_v27  ;;  %398 = vmatprep.subr.bf16.mxu1 %v1461_v0  ;;  %v1249_v27 = vld [vmem:[#allocation10 + $0x88] ss:$16 sps:$4 sm:$0xff]  }
  0x77   :  { %1114 = vmatprep.subr.bf16.mxu0 %v1205_v28  ;;  %v1257_v28 = vld [vmem:[#allocation10 + $0xac] ss:$16 sps:$4 sm:$0xff]  }
  0x79   :  { %399 = vmatpush1.bf16.msra.mxu1 %v1206_v33 }
  0x7a   :  { %1115 = vmatpush3.bf16.msra.mxu0 %v1207_v36  ;;  %400 = vmatprep.subr.bf16.mxu1 %v1461_v0  ;;  %v1222_v36 = vld [vmem:[#allocation10] ss:$16 sps:$4 sm:$0xff]  }
  0x7b   :  { %1136 = vmatprep.subr.bf16.mxu0 %v1463_v43 }
  0x7d   :  { %377 = vmatmul.mubr.bf16.vlgmr.msra.gmra.mrb[0].mxu0 %v129_v41  ;;  %401 = vmatpush1.bf16.msra.mxu1 %v342_v38  ;;  %v1230_v38 = vld [vmem:[#allocation10 + $0x24] ss:$16 sps:$4 sm:$0xff]   ;;  %v1234_v41 = vld [vmem:[#allocation10 + $0x40] ss:$16 sps:$4 sm:$0xff]  }
  0x7e   :  { %1137 = vmatpush3.bf16.msra.mxu0 %v1210_v40  ;;  %1156 = vmatprep.subr.bf16.mxu1 %v1463_v43  ;;  %v1236_v40 = vld [vmem:[#allocation10 + $0x44] ss:$16 sps:$4 sm:$0xff]  }
  0x7f   :  { %1138 = vmatprep.subr.bf16.mxu0 %v1463_v43  ;;  %1152 = vmatprep.mubr.msk.bf16.mxu0 %vm1464_vm2, %v1463_v43 }
  0x80   :  { %417 = vmatmul.mubr.bf16.vlgmr.msra.gmra.mrb[0].mxu1 %v131_v44  ;;  %v1248_v44 = vld [vmem:[#allocation10 + $0x84] ss:$16 sps:$4 sm:$0xff]  }
  0x81   :  { %1164 = vmatprep.mubr.msk.bf16.mxu1 %vm1464_vm2, %v1463_v43  ;;  %1157 = vmatpush3.bf16.msra.mxu1 %v1218_v3 }
  0x82   :  { %1139 = vmatpush3.bf16.msra.mxu0 %v1211_v45  ;;  %1158 = vmatprep.subr.bf16.mxu1 %v1463_v43  ;;  %v1246_v45 = vld [vmem:[#allocation10 + $0x80] ss:$16 sps:$4 sm:$0xff]  }
  0x83   :  { %1140 = vmatprep.subr.bf16.mxu0 %v1463_v43 }
  0x85   :  { %1159 = vmatpush3.bf16.msra.mxu1 %v1219_v4 }
  0x86   :  { %1141 = vmatpush3.bf16.msra.mxu0 %v1212_v46  ;;  %1160 = vmatprep.subr.bf16.mxu1 %v1463_v43  ;;  %v1254_v46 = vld [vmem:[#allocation10 + $0xa4] ss:$16 sps:$4 sm:$0xff]  }
  0x87   :  { %1142 = vmatprep.subr.bf16.mxu0 %v1463_v43 }
  0x89   :  { %1161 = vmatpush3.bf16.msra.mxu1 %v1220_v10 }
  0x8a   :  { %1143 = vmatpush3.bf16.msra.mxu0 %v1213_v47  ;;  %1162 = vmatprep.subr.bf16.mxu1 %v1463_v43  ;;  %v1252_v47 = vld [vmem:[#allocation10 + $0xa0] ss:$16 sps:$4 sm:$0xff]  }
  0x8b   :  { %1144 = vmatprep.subr.bf16.mxu0 %v1463_v43 }
  0x8d   :  { %1163 = vmatpush3.bf16.msra.mxu1 %v1221_v14 }
  0x8e   :  { %1145 = vmatpush3.bf16.msra.mxu0 %v1214_v48  ;;  %848 = vmatprep.subr.bf16.mxu1 %v1224_v15  ;;  %v1260_v48 = vld [vmem:[#allocation10 + $0xc4] ss:$16 sps:$4 sm:$0xff]  }
  0x8f   :  { %1146 = vmatprep.subr.bf16.mxu0 %v1463_v43 }
  0x92   :  { %1147 = vmatpush3.bf16.msra.mxu0 %v1215_v49  ;;  %v1266_v49 = vld [vmem:[#allocation10 + $0xe4] ss:$16 sps:$4 sm:$0xff]  }
  0x93   :  { %1148 = vmatprep.subr.bf16.mxu0 %v1463_v43 }
  0x96   :  { %1149 = vmatpush3.bf16.msra.mxu0 %v1216_v50  ;;  %v1269_v50 = vld [vmem:[#allocation10 + $0xec] ss:$16 sps:$4 sm:$0xff]  }
  0x97   :  { %1150 = vmatprep.subr.bf16.mxu0 %v1463_v43  ;;  %v1240_v43 = vld [vmem:[#allocation10 + $0x60] ss:$16 sps:$4 sm:$0xff]  }
  0x9a   :  { %1151 = vmatpush3.bf16.msra.mxu0 %v1217_v51  ;;  %v1264_v51 = vld [vmem:[#allocation10 + $0xe0] ss:$16 sps:$4 sm:$0xff]  }
  0x9b   :  { %889 = vmatprep.subr.bf16.mxu0 %v1227_v17 }
 0x150   :  { %v1116_v52 = vpop.f32.mrb[0].mxu0 }
 0x151   :  { %v1117_v53 = vpop.f32.mrb[1].mxu0 }
 0x152   :  { %v1118_v55 = vadd.f32 %v1117_v53, %v1116_v52  ;;  %v1119_v56 = vpop.f32.mrb[2].mxu0  ;;  %v1267_v52 = vld [vmem:[#allocation10 + $0xe8] ss:$16 sps:$4 sm:$0xff]   ;;  %v1055_v53 = vld [vmem:[%s1677_s7] ss:$0 sm:$0xff] }
 0x153   :  { %v1120_v57 = vpop.f32.mrb[3].mxu0  ;;  %v418_v58 = vpop.f32.mrb[0].mxu1 }
 0x154   :  { %v379_v59 = vadd.f32 %v1118_v55, %v1019_v54  ;;  %v420_v60 = vpop.f32.mrb[1].mxu1 }
 0x155   :  { %v421_v61 = vpop.f32.mrb[2].mxu1 }
 0x156   :  { %v419_v62 = vadd.f32 %v418_v58, %v379_v59  ;;  %v422_v63 = vpop.f32.mrb[3].mxu1 }
 0x158   :  { %v424_v1 = vmax.f32 %v419_v62, 0.0 }
 0x15a   :  { %v425_v2 = vpack.c.bf16 %v424_v1, %v424_v1 }
 0x15c   :  { %1153 = vmatmul.mubr.bf16.vlgmr.msra.gmra.mrb[4].mxu0 %v425_v2 }
 0x15d   :  { %921 = vmatprep.mubr.bf16.mxu0 %v1461_v0  ;;  %890 = vmatpush1.bf16.msra.mxu0 %v1225_v16 }
 0x15e   :  { %891 = vmatprep.subr.bf16.mxu0 %v1233_v18 }
 0x161   :  { %892 = vmatpush1.bf16.msra.mxu0 %v1231_v19 }
 0x162   :  { %893 = vmatprep.subr.bf16.mxu0 %v1239_v22 }
 0x165   :  { %894 = vmatpush1.bf16.msra.mxu0 %v1237_v23 }
 0x166   :  { %895 = vmatprep.subr.bf16.mxu0 %v1245_v24 }
 0x169   :  { %896 = vmatpush1.bf16.msra.mxu0 %v1243_v25 }
 0x16a   :  { %897 = vmatprep.subr.bf16.mxu0 %v1251_v26 }
 0x16d   :  { %898 = vmatpush1.bf16.msra.mxu0 %v1249_v27 }
 0x16e   :  { %899 = vmatprep.subr.bf16.mxu0 %v1257_v28 }
 0x171   :  { %900 = vmatpush1.bf16.msra.mxu0 %v1255_v29 }
 0x172   :  { %901 = vmatprep.subr.bf16.mxu0 %v1263_v30 }
 0x175   :  { %902 = vmatpush1.bf16.msra.mxu0 %v1261_v31 }
 0x176   :  { %903 = vmatprep.subr.bf16.mxu0 %v1269_v50 }
 0x179   :  { %904 = vmatpush1.bf16.msra.mxu0 %v1267_v52 }
 0x22f   :  { %v531_v6 = vpop.f32.mrb[4].mxu0 }
 0x230   :  { %v532_v7 = vadd.f32 %v1046_v5, %v531_v6  ;;  %v1154_v8 = vpop.f32.mrb[5].mxu0 }
 0x231   :  { %v534_v9 = vpop.f32.mrb[6].mxu0 }
 0x232   :  { %537 = vst [vmem:[#allocation12] sm:$0x3] %v532_v7  ;;  %v1155_v11 = vpop.f32.mrb[7].mxu0  ;;  %v538_v12 = vmul.f32 0.5, %v532_v7 }
 0x234   :  { %v539_v13 = vmul.f32 1.442695, %v538_v12 }
 0x236   :  { %1270 = vpow2.f32 %v539_v13 }
 0x240   :  { %v1271_v20 = vpop.eup %1270 }
 0x241   :  { %543 = vrot.lane.b32.xlu0 %v1271_v20, %s1453_s27 }
 0x2b3   :  { %v544_v33 = vpop.permute.xlu0 %543 }
 0x2b4   :  { %v546_v34 = vmul.f32 %v544_v33, %v541_v32 }
 0x2b6   :  { %v547_v35 = vadd.f32 %v546_v34, %v532_v7 }
 0x2b8   :  { %v548_v37 = vpack.c.bf16 %v547_v35, %v547_v35 }
 0x2ba   :  { %1165 = vmatmul.mubr.msk.bf16.vlgmr.msra.gmra.mrb[4].mxu1 %vm588_vm3, %v548_v37 }
 0x2bb   :  { %849 = vmatpush1.bf16.msra.mxu1 %v1222_v36  ;;  %880 = vmatprep.mubr.bf16.mxu1 %v1461_v0  ;;  %v1258_v0 = vld [vmem:[#allocation10 + $0xc0] ss:$16 sps:$4 sm:$0xff]  }
 0x2bc   :  { %850 = vmatprep.subr.bf16.mxu1 %v1230_v38 }
 0x2bf   :  { %851 = vmatpush1.bf16.msra.mxu1 %v1228_v39 }
 0x2c0   :  { %852 = vmatprep.subr.bf16.mxu1 %v1236_v40 }
 0x2c3   :  { %853 = vmatpush1.bf16.msra.mxu1 %v1234_v41 }
 0x2c4   :  { %854 = vmatprep.subr.bf16.mxu1 %v1242_v42 }
 0x2c7   :  { %855 = vmatpush1.bf16.msra.mxu1 %v1240_v43 }
 0x2c8   :  { %856 = vmatprep.subr.bf16.mxu1 %v1248_v44 }
 0x2cb   :  { %857 = vmatpush1.bf16.msra.mxu1 %v1246_v45 }
 0x2cc   :  { %858 = vmatprep.subr.bf16.mxu1 %v1254_v46 }
 0x2cf   :  { %859 = vmatpush1.bf16.msra.mxu1 %v1252_v47 }
 0x2d0   :  { %860 = vmatprep.subr.bf16.mxu1 %v1260_v48 }
 0x2d3   :  { %861 = vmatpush1.bf16.msra.mxu1 %v1258_v0 }
 0x2d4   :  { %862 = vmatprep.subr.bf16.mxu1 %v1266_v49 }
 0x2d7   :  { %863 = vmatpush1.bf16.msra.mxu1 %v1264_v51 }
 0x38d   :  { %v626_v54 = vpop.f32.mrb[4].mxu1 }
 0x38e   :  { %v627_v55 = vadd.f32 %v1055_v53, %v626_v54  ;;  %v1166_v56 = vpop.f32.mrb[5].mxu1 }
 0x38f   :  { %v629_v57 = vpop.f32.mrb[6].mxu1 }
 0x390   :  { %v632_v58 = vmax.f32 %v627_v55, 0.0  ;;  %v1167_v59 = vpop.f32.mrb[7].mxu1 }
 0x392   :  { %v633_v60 = vpack.c.bf16 %v632_v58, %v632_v58 }
 0x394   :  { %881 = vmatmul.mubr.bf16.vlgmr.msra.gmra.mrb[8].mxu1 %v633_v60  ;;  %922 = vmatmul.mubr.bf16.vlgmr.msra.gmra.mrb[8].mxu0 %v633_v60 }
 0x395   :  { %1409 = shalt.err (!%p1406_p2)
}
 0x396   :  { %s1410_s0 = scalar_lea.hbm %s1681_s11, 32 }
 0x397   :  { %p1411_p3 = scmp.ne.s32.totalorder %s1681_s11, %s1410_s0  ;;  %p1414_p4 = scmp.lt.u32.totalorder %s1410_s0, %s1681_s11 }
 0x399   :  { %p1416_p5 = pnand %p1414_p4, %p1411_p3 }
 0x39b   :  { %1419 = shalt.err (!%p1416_p5)
}
 0x39c   :  { %1007 = dma.vmem_to_hbm [thread:$0]  %s1005_s25, 32, %s1681_s11, [#allocation13]   ;;  %v670_v61 = vsub.s32 0, %v1602_v21  ;;  %v678_v62 = vsub.s32 2, %v1602_v21  ;;  %v666_v63 = vld [vmem:[%s1679_s9] sm:$0xf] }
 0x39d   :  { %v674_v1 = vsub.s32 1, %v1602_v21  ;;  %v682_v2 = vsub.s32 3, %v1602_v21  ;;  %v1466_v32 = vmov 1966171168   ;;  %s1467_s9 = smov [#allocation11]  }
 0x39e   :  { %v671_v3 = vrot.slane %v666_v63, %v670_v61  ;;  %v679_v4 = vrot.slane %v666_v63, %v678_v62  ;;  %v965_v33 = vunpack.c.l.s4 %v1466_v32  ;;  %s994_s11 = sshll.u32 %s1467_s9, 4  ;;  %s995_s11 = int_to_ptr.vmem [resolvable:$true] %s994_s11 }
 0x39f   :  { %v675_v5 = vrot.slane %v666_v63, %v674_v1  ;;  %v683_v6 = vrot.slane %v666_v63, %v682_v2  ;;  %s1420_s19 = scalar_lea.vmem %s995_s11, 64  ;;  %p1425_p7 = scmp.lt.s32.totalorder %s995_s11, %s995_s11 }
 0x3a0   :  { %v966_v34 = vunpack.c.0.s8 %v965_v33  ;;  %p1421_p6 = scmp.ne.s32.totalorder %s995_s11, %s1420_s19  ;;  %p1426_p8 = scmp.lt.s32.totalorder %s1420_s19, %s1420_s19 }
 0x3a2   :  { %v969_v37 = vsub.s32 %v966_v34, %v1602_v21  ;;  %p1427_p9 = por %p1426_p8, %p1425_p7 }
 0x3a4   :  { %p1428_p10 = pnand %p1427_p9, %p1421_p6 }
 0x467   :  { %v882_v7 = vpop.f32.mrb[8].mxu1  ;;  %v923_v8 = vpop.f32.mrb[8].mxu0 }
 0x468   :  { %v883_v9 = vadd.f32 %v882_v7, %v671_v3  ;;  %v924_v10 = vadd.f32 %v923_v8, %v679_v4  ;;  %v884_v11 = vpop.f32.mrb[9].mxu1  ;;  %v925_v12 = vpop.f32.mrb[9].mxu0 }
 0x469   :  { %v885_v13 = vadd.f32 %v884_v11, %v675_v5  ;;  %v926_v14 = vadd.f32 %v925_v12, %v683_v6  ;;  %v886_v15 = vpop.f32.mrb[10].mxu1  ;;  %v927_v16 = vpop.f32.mrb[10].mxu0 }
 0x46a   :  { %v1093_v17 = vmul.f32 -1.442695, %v883_v9  ;;  %v1095_v18 = vmul.f32 -1.442695, %v924_v10  ;;  %v887_v19 = vpop.f32.mrb[11].mxu1  ;;  %v928_v20 = vpop.f32.mrb[11].mxu0 }
 0x46b   :  { %v1094_v22 = vmul.f32 -1.442695, %v885_v13  ;;  %v1096_v23 = vmul.f32 -1.442695, %v926_v14 }
 0x46c   :  { %1272 = vpow2.f32 %v1093_v17 }
 0x46d   :  { %1274 = vpow2.f32 %v1095_v18 }
 0x46e   :  { %1276 = vpow2.f32 %v1094_v22 }
 0x46f   :  { %1278 = vpow2.f32 %v1096_v23 }
 0x476   :  { %v1273_v24 = vpop.eup %1272 }
 0x477   :  { %v1275_v25 = vpop.eup %1274  ;;  %v942_v26 = vadd.f32 1.0, %v1273_v24 }
 0x478   :  { %v1277_v27 = vpop.eup %1276  ;;  %v944_v28 = vadd.f32 1.0, %v1275_v25 }
 0x479   :  { %v1279_v29 = vpop.eup %1278  ;;  %1280 = vrcp.f32 %v942_v26  ;;  %v943_v30 = vadd.f32 1.0, %v1277_v27 }
 0x47a   :  { %1282 = vrcp.f32 %v944_v28  ;;  %v945_v31 = vadd.f32 1.0, %v1279_v29 }
 0x47b   :  { %1284 = vrcp.f32 %v943_v30 }
 0x47c   :  { %1286 = vrcp.f32 %v945_v31 }
 0x483   :  { %v1281_v35 = vpop.eup %1280 }
 0x484   :  { %v1283_v36 = vpop.eup %1282 }
 0x485   :  { %v1285_v38 = vpop.eup %1284 }
 0x486   :  { %v1287_v39 = vpop.eup %1286  ;;  %v1097_v40 = vpack.c.bf16 %v1285_v38, %v1281_v35 }
 0x487   :  { %v1098_v41 = vpack.c.bf16 %v1287_v39, %v1283_v36 }
 0x488   :  { %v970_v42 = vrot.slane %v1097_v40, %v969_v37 }
 0x489   :  { %v977_v43 = vrot.slane %v1098_v41, %v969_v37 }
 0x48b   :  { %v978_v44 = vcombine.low %v970_v42, %v977_v43 }
 0x48d   :  { %1099 = vst.sshfl [vmem:[#allocation11] sm:$0x55 pattern:$0x73625140] %v978_v44 }
 0x48e   :  { %1431 = shalt.err (!%p1428_p10)
}
 0x48f   :  { %s1432_s28 = scalar_lea.hbm %s1680_s10, 64 }
 0x490   :  { %p1433_p11 = scmp.ne.s32.totalorder %s1680_s10, %s1432_s28  ;;  %p1436_p12 = scmp.lt.u32.totalorder %s1432_s28, %s1680_s10 }
 0x492   :  { %p1438_p13 = pnand %p1436_p12, %p1433_p11 }
 0x494   :  { %1441 = shalt.err (!%p1438_p13)
}
 0x495   :  { %997 = dma.vmem_to_hbm [thread:$0]  %s995_s11, 64, %s1680_s10, [#allocation4]  }
 0x496   :  { %1448 = dma.done.wait [#allocation4], 64  }
 0x497   :  { %1449 = vsyncadd [#allocation4], 4294967232 }
 0x498   :  { %1450 = dma.done.wait [#allocation13], 32  }
 0x499   :  { %1451 = vsyncadd [#allocation13], 4294967264 }
 0x49a   :  { %1014 = vsyncpa [#allocation3], 1 }
 0x49b   :  { %1015 = vsyncpa [#allocation6], 1 }
 0x49c   :  { %1016 = vsyncpa [#allocation9], 1 }
 0x49d   :  { %1017 = vsyncpa [#allocation4], 1 }
 0x49e   :  { %1018 = vsyncpa [#allocation13], 1 }

</bundles_post_ra>
